<compile_context>
chip_gen: v6e
topology: v6e:2x2x1
jax: 0.10.0
libtpu: 0.0.40
codegen_flags: <defaults>
</compile_context>

<pallas_src>
import jax
import jax.numpy as jnp
from jax.experimental import pallas as pl
from jax.experimental.pallas import tpu as pltpu

EPS = 1e-10


def _l2norm_kernel(w_ref, x_ref, o_ref):
    # x_ref: (nb, C, T) tile (C on sublanes, HW on lanes); w_ref: (C, 1).
    x = x_ref[...].astype(jnp.float32)
    sq_sum = jnp.sum(x * x, axis=1, keepdims=True)           # (nb, 1, T) — C reduce only
    inv = 1.0 / (jnp.sqrt(sq_sum) + EPS)                      # exact, matches torch.div
    y = (x * inv) * w_ref[...].astype(jnp.float32)            # (C,1) -> (1,C,1) broadcast
    o_ref[...] = y.astype(o_ref.dtype)


def _round_up(v, m):
    return (v + m - 1) // m * m


def _tpu_defaults():
    """(target_block_bytes, vmem_limit_bytes) per TPU generation."""
    kind = ""
    try:
        kind = jax.devices()[0].device_kind.lower()
    except Exception:
        pass
    if "v7" in kind:
        return 4 << 20, 32 << 20          # v7x: 64 MiB physical VMEM — stay tight
    if ("v5" in kind) or ("v6" in kind):
        return 6 << 20, 64 << 20          # 128 MiB physical VMEM — bigger blocks free
    return 4 << 20, 32 << 20              # unknown chip: conservative (v7x-safe)


def _choose_blocking(N, C, HW, itemsize, target_block_bytes):
    """Pick (nb, tile_hw).  Byte math uses sublane-padded C (real VMEM footprint)."""
    packing = max(8, 32 // max(1, itemsize))          # 8 f32, 16 bf16, 32 int8
    c_pad = _round_up(C, packing)
    row_bytes = c_pad * itemsize                      # one (C_pad, 1) lane column
    slab_bytes = row_bytes * HW                       # one batch row, full HW

    # Small per-image slab: pack several batch rows per block, full HW on lanes.
    if N > 1 and slab_bytes <= max(1 << 20, target_block_bytes // 2):
        nb = max(1, min(N, target_block_bytes // max(1, slab_bytes)))
        return nb, HW
    # Full-HW block if it is within ~2x of target (avoids any edge padding).
    if slab_bytes <= 2 * target_block_bytes:
        return 1, HW
    # Otherwise: balanced lane tiles, multiples of 128 (no tiny/mostly-padded edge).
    lanes_budget = max(128, (target_block_bytes // max(1, row_bytes)) // 128 * 128)
    num_tiles = pl.cdiv(HW, lanes_budget)
    tile_hw = min(HW, _round_up(pl.cdiv(HW, num_tiles), 128))
    return 1, tile_hw


def l2norm(x_nchw: jax.Array, weight: jax.Array, *,
           target_block_bytes: int | None = None,
           vmem_limit_bytes: int | None = None,
           batch_block: int | None = None,
           tile_hw: int | None = None) -> jax.Array:
    """x_nchw: (N, C, H, W); weight: (C,). Returns (N, C, H, W)."""
    N, C, H, W = x_nchw.shape
    HW = H * W
    itemsize = jnp.dtype(x_nchw.dtype).itemsize

    auto_tb, auto_vmem = _tpu_defaults()
    if target_block_bytes is None:
        target_block_bytes = auto_tb
    if vmem_limit_bytes is None:
        vmem_limit_bytes = auto_vmem

    if batch_block is None and tile_hw is None:
        nb, thw = _choose_blocking(N, C, HW, itemsize, target_block_bytes)
        # Megacore (v7x has 2 TCs): make sure the "parallel" grid has >= 2 steps
        # when the problem allows; costs at most one extra ~0.35 us step elsewhere.
        if pl.cdiv(N, nb) * pl.cdiv(HW, thw) < 2:
            if nb > 1:
                nb = pl.cdiv(N, 2)
            elif HW >= 256:
                thw = _round_up(pl.cdiv(HW, 2), 128)
    else:
        nb = batch_block if batch_block is not None else 1
        thw = tile_hw if tile_hw is not None else HW

    nb = max(1, min(nb, N))
    if thw >= HW:
        thw = HW                                   # full extent: always legal
    elif thw % 128 != 0:
        thw = _round_up(thw, 128)                  # lane tiles must be 128-multiples

    x3 = x_nchw.reshape(N, C, HW)                  # free reshape — no data movement
    w2 = weight.reshape(C, 1)

    grid = (pl.cdiv(N, nb), pl.cdiv(HW, thw))

    cost = pl.CostEstimate(
        flops=3 * N * C * HW,
        transcendentals=N * HW,
        bytes_accessed=2 * N * C * HW * itemsize + C * itemsize,
    )

    out3 = pl.pallas_call(
        _l2norm_kernel,
        out_shape=jax.ShapeDtypeStruct((N, C, HW), x3.dtype),
        grid_spec=pltpu.PrefetchScalarGridSpec(
            num_scalar_prefetch=0,
            grid=grid,
            in_specs=[
                # per-channel scale, resident across all grid steps
                pl.BlockSpec((C, 1), lambda n, j: (0, 0)),
                # x tile: nb batch rows, full C on sublanes, HW tile on lanes
                pl.BlockSpec((nb, C, thw), lambda n, j: (n, 0, j)),
            ],
            out_specs=pl.BlockSpec((nb, C, thw), lambda n, j: (n, 0, j)),
        ),
        compiler_params=pltpu.CompilerParams(
            dimension_semantics=("parallel", "parallel"),
            vmem_limit_bytes=vmem_limit_bytes,
        ),
        cost_estimate=cost,
    )(w2, x3)

    return out3.reshape(N, C, H, W)


def l2norm_ref(x_nchw, weight):
    norm = jnp.sqrt(jnp.sum(x_nchw * x_nchw, axis=1, keepdims=True)) + EPS
    xn = x_nchw / norm
    w = weight.reshape(1, -1, 1, 1)
    return w * xn


if __name__ == "__main__":
    key = jax.random.PRNGKey(0)
    N, C, H, W = 2, 4, 16, 16
    scale = 20.0

    x = jax.random.normal(key, (N, C, H, W), dtype=jnp.float32)
    # Deterministic parameter init, matching init.constant_(weight, scale).
    weight = jnp.full((C,), scale, dtype=jnp.float32)

    ref = l2norm_ref(x, weight)

    # Default (auto) blocking path.
    out = jax.block_until_ready(l2norm(x, weight))
    assert out.shape == (N, C, H, W)
    assert jnp.allclose(out, ref, atol=1e-5, rtol=1e-5), "mismatch vs reference"

    # Exercise the multi-tile path over the HW axis (grid = (2, 2)).
    out_tiled = jax.block_until_ready(l2norm(x, weight, tile_hw=128))
    assert jnp.allclose(out_tiled, ref, atol=1e-5, rtol=1e-5), "tiled mismatch"

    # Exercise the batch-blocked path (nb = 2, single HW tile, C reduce on axis=1).
    out_batched = jax.block_until_ready(l2norm(x, weight, batch_block=2))
    assert jnp.allclose(out_batched, ref, atol=1e-5, rtol=1e-5), "batched mismatch"

    print("KERNEL_OK")
</pallas_src>

<mosaic_0001>
module attributes {stable_mosaic.version = 11 : i64} {
  func.func @_l2norm_kernel(%arg0: i32, %arg1: i32, %arg2: memref<4x1xf32, #tpu.memory_space<vmem>>, %arg3: memref<1x4x256xf32, #tpu.memory_space<vmem>>, %arg4: memref<1x4x256xf32, #tpu.memory_space<vmem>>) attributes {dimension_semantics = [#tpu.dimension_semantics<parallel>, #tpu.dimension_semantics<parallel>], iteration_bounds = array<i64: 2, 1>, scalar_prefetch = 0 : i64, scratch_operands = 0 : i64, tpu.core_type = #tpu.core_type<tc>, window_params = [{pipeline_mode = #tpu.pipeline_mode<synchronous>, transform_indices = @transform_0, window_bounds = array<i64: 4, 1>}, {transform_indices = @transform_1, window_bounds = array<i64: 1, 4, 256>}, {transform_indices = @transform_2, window_bounds = array<i64: 1, 4, 256>}]} {
    %c0 = arith.constant 0 : index
    %c0_0 = arith.constant 0 : index
    %c0_1 = arith.constant 0 : index
    %0 = vector.load %arg3[%c0, %c0_0, %c0_1] : memref<1x4x256xf32, #tpu.memory_space<vmem>>, vector<1x4x256xf32>
    %1 = arith.mulf %0, %0 : vector<1x4x256xf32>
    %cst = arith.constant dense<0.000000e+00> : vector<1x256xf32>
    %2 = vector.multi_reduction <add>, %1, %cst [1] : vector<1x4x256xf32> to vector<1x256xf32>
    %3 = vector.shape_cast %2 : vector<1x256xf32> to vector<1x1x256xf32>
    %4 = math.sqrt %3 : vector<1x1x256xf32>
    %cst_2 = arith.constant 1.000000e-10 : f32
    %5 = vector.broadcast %cst_2 : f32 to vector<1x1x256xf32>
    %6 = arith.addf %4, %5 : vector<1x1x256xf32>
    %cst_3 = arith.constant 1.000000e+00 : f32
    %7 = vector.broadcast %cst_3 : f32 to vector<1x1x256xf32>
    %8 = arith.divf %7, %6 : vector<1x1x256xf32>
    %9 = vector.broadcast %8 : vector<1x1x256xf32> to vector<1x4x256xf32>
    %10 = arith.mulf %0, %9 : vector<1x4x256xf32>
    %c0_4 = arith.constant 0 : index
    %c0_5 = arith.constant 0 : index
    %11 = vector.load %arg2[%c0_4, %c0_5] : memref<4x1xf32, #tpu.memory_space<vmem>>, vector<4x1xf32>
    %12 = vector.shape_cast %11 : vector<4x1xf32> to vector<1x4x1xf32>
    %13 = vector.broadcast %12 : vector<1x4x1xf32> to vector<1x4x256xf32>
    %14 = arith.mulf %10, %13 : vector<1x4x256xf32>
    %c0_6 = arith.constant 0 : index
    %c0_7 = arith.constant 0 : index
    %c0_8 = arith.constant 0 : index
    %15 = vector.load %arg4[%c0_6, %c0_7, %c0_8] : memref<1x4x256xf32, #tpu.memory_space<vmem>>, vector<1x4x256xf32>
    tpu.vector_store %arg4[%c0_6, %c0_7, %c0_8], %14 {strides = array<i32>} : memref<1x4x256xf32, #tpu.memory_space<vmem>>, vector<1x4x256xf32>,
    return
  }
  func.func @transform_0(%arg0: i32, %arg1: i32) -> (i32, i32) {
    %c0_i32 = arith.constant 0 : i32
    %c0_i32_0 = arith.constant 0 : i32
    %c0_i32_1 = arith.constant 0 : i32
    return %c0_i32, %c0_i32_0 : i32, i32
  }
  func.func @transform_1(%arg0: i32, %arg1: i32) -> (i32, i32, i32) {
    %c0_i32 = arith.constant 0 : i32
    %c0_i32_0 = arith.constant 0 : i32
    return %arg0, %c0_i32, %arg1 : i32, i32, i32
  }
  func.func @transform_2(%arg0: i32, %arg1: i32) -> (i32, i32, i32) {
    %c0_i32 = arith.constant 0 : i32
    %c0_i32_0 = arith.constant 0 : i32
    return %arg0, %c0_i32, %arg1 : i32, i32, i32
  }
}

</mosaic_0001>

<bundles_post_ra>
// kernel: tpu_custom_call.1
= control target key start
LH: loop header
LB: loop body
LE: loop exit
PB: predicated region body
PF: predicated region fallthrough
CT: control target
= control target key end

     0   :  { %7 = vsyncpa [#allocation3], 0  ;;  %s701_s0 = inlined_call_operand.vmem [shape: f32[4,1], index: 0, kind: input, shape index: {}]   ;;  %s702_s1 = inlined_call_operand.hbm [shape: f32[2,4,256], index: 1, kind: input, shape index: {}]   ;;  %s703_s2 = inlined_call_operand.hbm [shape: f32[2,4,256], index: 2, kind: output, shape index: {}]  }
   0x1   :  { %9 = vsyncpa [#allocation3 + $0x1], 0 }
   0x2   :  { %10 = vsyncpa [#allocation4], 0 }
   0x3   :  { %12 = vsyncpa [#allocation4 + $0x1], 0  ;;  %s560_s9 = smov 0   ;;  %s562_s10 = smov 0  }
   0x4   :  { %s564_s11 = smov 0   ;;  %s566_s12 = smov 0  }
   0x5   :  { %s568_s13 = smov 0   ;;  %s570_s14 = smov 0  }
   0x6 LB: > { %s341_s15 = sadd.s32 4294967295, %s539_s14   ;;  %s342_s16 = sadd.s32 4294967294, %s539_s14   ;;  %s539_s14 = sphi %s570_s14, %s18_s14   ;;  %s535_s13 = sphi %s568_s13, %s715_s13   ;;  %s531_s12 = sphi %s566_s12, %s714_s12   ;;  %s527_s11 = sphi %s564_s11, %s713_s11   ;;  %s523_s10 = sphi %s562_s10, %s712_s10   ;;  %s519_s9 = sphi %s560_s9, %s711_s9  }
   0x7   : > { %s30_s17 = sadd.s32 1, %s535_s13  ;;  %s60_s18 = sadd.s32 1, %s527_s11 }
   0x8   : > { %p32_p0 = scmp.ge.s32.totalorder %s30_s17, 2  ;;  %p67_p1 = scmp.ne.s32.totalorder %s527_s11, %s523_s10 }
   0x9   : > { %p68_p2 = scmp.eq.s32.totalorder %s539_s14, 0  ;;  %p73_p3 = scmp.ne.s32.totalorder %s523_s10, %s519_s9 }
   0xa   : > { %s717_s17 = smov (%p32_p0, %s30_s17), 0  ;;  %p74_p5 = scmp.eq.s32.totalorder %s341_s15, 0 }
   0xb   : > { %p601_p4 = por %p68_p2, %p67_p1  ;;  %s55_s20 = ssub.s32 %s535_s13, %s717_s17 }
   0xc   : > { %p99_p6 = scmp.eq.s32.totalorder %s341_s15, 1  ;;  %p58_p7 = scmp.eq.s32.totalorder %s55_s20, 0 }
   0xd   : > { %p607_p8 = por %p74_p5, %p73_p3  ;;  %p105_p10 = scmp.eq.s32.totalorder %s342_s16, 1 }
   0xe   : > { %p611_p9 = por %p99_p6, %p67_p1  ;;  %p370_p13 = scmp.lt.s32.totalorder %s539_s14, 2 }
   0xf   : > { %s616_s23 = scalar_select %p58_p7, %s527_s11, %s60_s18  }
  0x10   : > { %p618_p11 = por %p105_p10, %p73_p3  ;;  %s128_s25 = sand.u32 1, %s527_s11  }
  0x11   : > { %s345_s26 = sshll.u32 %s128_s25, 3  ;;  %s356_s27 = sshll.u32 %s535_s13, 7 }
  0x12   : > { %s707_s24 = scalar_select %p618_p11, 1, 0 }
  0x13   : > { %s140_s30 = scalar_lea.hbm %s702_s1, %s356_s27  ;;  %s132_s3 = scalar_lea.vmem [#allocation2], %s345_s26 }
  0x14   : > { %s142_s4 = sshll.u32 %s132_s3, 4  ;;  %p631_p0 = pnand %p370_p13, %p601_p4  ;;  %s143_s4 = int_to_ptr.vmem [resolvable:$true] %s142_s4 }
  0x15   : > { %p348_p1 = scmp.ge.s32.totalorder %s539_s14, 1  ;;  %p147_p2 = scmp.lt.s32.totalorder %s539_s14, 3 }
  0x16   : > { %s129_s6 = scalar_lea.sflag [#allocation3], %s128_s25  ;;  %p433_p3 = pneg %p631_p0 }
  0x17   : > { %s444_s7 = scalar_lea.vmem %s143_s4, 128  ;;  %s541_s8 = smov [#allocation2]  }
  0x18   : > { %p445_p5 = scmp.ne.s32.totalorder %s143_s4, %s444_s7  ;;  %s449_s15 = sshll.u32 %s541_s8, 4  ;;  %s450_s15 = int_to_ptr.vmem [resolvable:$false] %s449_s15 }
  0x19   : > { %s451_s16 = scalar_lea.vmem %s450_s15, 256  ;;  %p452_p10 = scmp.lt.s32.totalorder %s143_s4, %s450_s15 }
  0x1a   : > { %p447_p6 = pnand %p445_p5, %p433_p3  ;;  %p453_p12 = scmp.lt.s32.totalorder %s451_s16, %s444_s7 }
  0x1c   : > { %p448_p7 = pneg %p447_p6  ;;  %p454_p4 = por %p453_p12, %p452_p10 }
  0x1e   : > { %p455_p13 = pnand %p454_p4, %p448_p7 }
  0x20   : > { %458 = shalt.err (!%p455_p13)
}
  0x21   : > { %365 = dma.hbm_to_vmem [thread:$0]  (!%p631_p0), %s140_s30, 128, %s143_s4, %s129_s6  }
  0x22   : > { %p148_p11 = pnand %p348_p1, %p147_p2 }
  0x23   : > { %s646_s18 = sand.u32 (!%p148_p11), 1, %s523_s10  }
  0x24   : > { %151 = sbr.rel (%p148_p11) target bundleno = 185 (0xb9), region = 28  ;;  %s349_s19 = sshll.u32 (!%p148_p11), %s646_s18, 3 }
  0x25   : > { %s154_s20 = scalar_lea.sflag (!%p148_p11), [#allocation3], %s646_s18  ;;  %s157_s25 = scalar_lea.vmem (!%p148_p11), [#allocation2], %s349_s19 }
  0x29   : > { %510 = dma.done.wait (%p607_p8), %s154_s20, 128  }
  0x2a   : > { %512 = vsyncadd (%p607_p8), %s154_s20, 4294967168  ;;  %v542_v0 = vmov 0   ;;  %v225_v1 = vld [vmem:[%s701_s0] sm:$0xf]  ;;  %vm185_vm0 = vcmask 1043456   ;;  %v233_v33 = vlaneseq  ;;  %s357_s21 = sshll.u32 %s531_s12, 7 }
  0x2b   : > { %422 = vset.pattern.permute.xlu0 %v542_v0  ;;  %v180_v2 = vld [vmem:[%s157_s25] sm:$0xff]  ;;  %v543_v31 = vmov 839922192   ;;  %s177_s28 = scalar_lea.vmem [#allocation5], %s349_s19  ;;  %s255_s4 = scalar_lea.hbm %s703_s2, %s357_s21 }
  0x2c   : > { %228 = vperm.xlu0 %422, %v225_v1   ;;  %v181_v3 = vmul.f32 %v180_v2, %v180_v2  ;;  %v231_v32 = vunpack.c.l.s4 %v543_v31  ;;  %v234_v37 = vshrl.u32 %v233_v33, 7  ;;  %s257_s29 = sshll.u32 %s177_s28, 4  ;;  %s241_s5 = scalar_lea.sflag [#allocation4], %s646_s18  ;;  %s258_s29 = int_to_ptr.vmem [resolvable:$true] %s257_s29 }
  0x2d   : > { %s459_s6 = scalar_lea.vmem %s258_s29, 128  ;;  %s544_s7 = smov [#allocation5]  }
  0x2e   : > { %v183_v4 = vcombine.high %v181_v3, %v181_v3  ;;  %v186_v5 = vsel %vm185_vm0, %v181_v3, 0.0  ;;  %v232_v36 = vunpack.c.0.s8 %v231_v32  ;;  %p460_p8 = scmp.ne.s32.totalorder %s258_s29, %s459_s6  ;;  %s463_s8 = sshll.u32 %s544_s7, 4  ;;  %s464_s8 = int_to_ptr.vmem [resolvable:$false] %s463_s8 }
  0x2f   : > { %v187_v7 = vrot.slane %v186_v5, 4  ;;  %s465_s12 = scalar_lea.vmem %s464_s8, 256  ;;  %p466_p0 = scmp.lt.s32.totalorder %s258_s29, %s464_s8 }
  0x30   : > { %v193_v6 = vsel %vm185_vm0, %v183_v4, 0.0  ;;  %v235_v39 = vsub.s32 %v232_v36, %v234_v37  ;;  %p461_p11 = pnand %p460_p8, %p611_p9  ;;  %p467_p1 = scmp.lt.s32.totalorder %s465_s12, %s459_s6 }
  0x31   : > { %v194_v8 = vrot.slane %v193_v6, 4  ;;  %v188_v9 = vadd.f32 %v187_v7, %v186_v5 }
  0x32   : > { %p462_p12 = pneg %p461_p11  ;;  %p468_p2 = por %p467_p1, %p466_p0 }
  0x33   : > { %v195_v10 = vadd.f32 %v194_v8, %v193_v6  ;;  %v189_v11 = vrot.slane %v188_v9, 2 }
  0x34   : > { %p469_p3 = pnand %p468_p2, %p462_p12 }
  0x35   : > { %v196_v12 = vrot.slane %v195_v10, 2  ;;  %v190_v13 = vadd.f32 %v189_v11, %v188_v9 }
  0x37   : > { %v197_v14 = vadd.f32 %v196_v12, %v195_v10  ;;  %v191_v15 = vrot.slane %v190_v13, 1 }
  0x39   : > { %v198_v16 = vrot.slane %v197_v14, 1  ;;  %v192_v17 = vadd.f32 %v191_v15, %v190_v13 }
  0x3b   : > { %v199_v18 = vadd.f32 %v198_v16, %v197_v14  ;;  %423 = vrsqrt.f32 %v192_v17  ;;  %vm202_vm1 = vcmp.eq.f32.partialorder %v192_v17, inf  ;;  %v205_v23 = vand.u32 2147483648, %v192_v17 }
  0x3c   : > { %vm204_vm3 = vcmp.eq.f32.partialorder %v192_v17, 0.0 }
  0x3d   : > { %425 = vrsqrt.f32 %v199_v18  ;;  %vm209_vm2 = vcmp.eq.f32.partialorder %v199_v18, inf  ;;  %v212_v25 = vand.u32 2147483648, %v199_v18  ;;  %vm211_vm4 = vcmp.eq.f32.partialorder %v199_v18, 0.0 }
  0x48   : > { %v424_v19 = vpop.eup %423 }
  0x49   : > { %v201_v21 = vmul.f32 %v424_v19, %v192_v17 }
  0x4a   : > { %v426_v20 = vpop.eup %425 }
  0x4b   : > { %v208_v22 = vmul.f32 %v426_v20, %v199_v18  ;;  %v203_v24 = vsel %vm202_vm1, %v192_v17, %v201_v21 }
  0x4c   : > { %v206_v27 = vsel %vm204_vm3, %v205_v23, %v203_v24 }
  0x4d   : > { %v210_v26 = vsel %vm209_vm2, %v199_v18, %v208_v22  ;;  %v214_v29 = vadd.f32 1e-10, %v206_v27 }
  0x4e   : > { %v213_v28 = vsel %vm211_vm4, %v212_v25, %v210_v26 }
  0x4f   : > { %v215_v30 = vadd.f32 1e-10, %v213_v28  ;;  %427 = vrcp.f32 %v214_v29 }
  0x51   : > { %429 = vrcp.f32 %v215_v30 }
  0x5c   : > { %v428_v34 = vpop.eup %427 }
  0x5e   : > { %v430_v35 = vpop.eup %429 }
  0x5f   : > { %v222_v38 = vcombine.low %v428_v34, %v430_v35 }
  0x61   : > { %v224_v40 = vmul.f32 %v222_v38, %v180_v2 }
  0xa7   : > { %v229_v41 = vpop.permute.xlu0 %228 }
  0xa8   : > { %v236_v42 = vrot.slane %v229_v41, %v235_v39 }
  0xaa   : > { %v238_v43 = vmul.f32 %v236_v42, %v224_v40 }
  0xac   : > { %239 = vst [vmem:[%s177_s28] sm:$0xff] %v238_v43 }
  0xad   : > { %472 = shalt.err (!%p469_p3)
}
  0xae   : > { %s473_s15 = scalar_lea.hbm %s255_s4, 128  ;;  %s477_s19 = scalar_lea.hbm %s703_s2, 256 }
  0xaf   : > { %p474_p5 = scmp.ne.s32.totalorder %s255_s4, %s473_s15  ;;  %p478_p10 = scmp.lt.s32.totalorder %s255_s4, %s703_s2 }
  0xb0   : > { %p479_p4 = scmp.lt.s32.totalorder %s477_s19, %s473_s15 }
  0xb1   : > { %p475_p6 = pnand %p474_p5, %p611_p9 }
  0xb2   : > { %p480_p13 = por %p479_p4, %p478_p10 }
  0xb3   : > { %p476_p7 = pneg %p475_p6 }
  0xb5   : > { %p481_p8 = pnand %p480_p13, %p476_p7 }
  0xb7   : > { %484 = shalt.err (!%p481_p8)
}
  0xb8   : > { %360 = dma.vmem_to_hbm [thread:$0]  (%p611_p9), %s258_s29, 128, %s255_s4, %s241_s5  }
  0xb9 PF: > { %s269_s26 = sand.u32 1, %s519_s9   ;;  %p709_p11 = scmp.ne.s32.totalorder %s707_s24, 0 }
  0xba   : > { %p710_p12 = scmp.ge.s32.totalorder %s539_s14, 2  ;;  %s270_s27 = scalar_lea.sflag [#allocation4], %s269_s26 }
  0xbc   : > { %p367_p0 = pnand %p710_p12, %p709_p11 }
  0xbe   : > { %p368_p1 = pneg %p367_p0 }
  0xc0   : > { %514 = dma.done.wait (%p368_p1), %s270_s27, 128  }
  0xc1   : > { %516 = vsyncadd (%p368_p1), %s270_s27, 4294967168  ;;  %s18_s14 = sadd.s32 1, %s539_s14   ;;  %s711_s9 = smov %s523_s10 }
  0xc2   : > { %p15_p2 = scmp.ge.s32.totalorder %s18_s14, 4   ;;  %s712_s10 = smov %s527_s11 }
  0xc3   : > { %s713_s11 = smov %s616_s23  ;;  %s714_s12 = smov %s535_s13 }
  0xc4   : > { %s715_s13 = smov %s717_s17  ;;  %17 = sbr.rel (!%p15_p2) target bundleno = 6 (0x6), region = 73 }
  0xc9   :  { %275 = vsyncpa [#allocation3], 1 }
  0xca   :  { %277 = vsyncpa [#allocation3 + $0x1], 1 }
  0xcb   :  { %278 = vsyncpa [#allocation4], 1 }
  0xcc   :  { %280 = vsyncpa [#allocation4 + $0x1], 1 }

</bundles_post_ra>
